<compile_context>
chip_gen: v7x
topology: tpu7x:2x2x1
jax: 0.10.0
libtpu: 0.0.40
codegen_flags: <defaults>
</compile_context>

<pallas_src>
import jax
import jax.numpy as jnp
from jax.experimental import pallas as pl
from jax.experimental.pallas import tpu as pltpu


PACK = 4          # 4 copies of the 32-wide problem per 128-lane row
MAX_TM = 2048     # max packed-row tile (= 8192 original rows per grid step)


def _round_up(x, m):
    return (x + m - 1) // m * m


# ------------------------------------------------------------------
# Fused kernel (all operands lane-dense, 128 wide):
#   a_ref : (tm, 128) bf16  packed im2col rows (col 27 of each 32-block = 1.0)
#   wc_ref: (128,128) bf16  block-diag conv weight (bias folded into row 27)
#   w1_ref: (128,128) bf16  block-diag W1 (cols 28..31 of each block zero)
#   w2_ref: (128,128) bf16  block-diag W2 (rows 28..31 of each block zero)
#   o_ref : (tm, 128) bf16
# ------------------------------------------------------------------
def fused_model_kernel(a_ref, wc_ref, w1_ref, w2_ref, o_ref):
    # conv as matmul (bias already folded) + sigmoid
    conv = jnp.dot(a_ref[...], wc_ref[...], preferred_element_type=jnp.float32)
    v2 = jax.nn.sigmoid(conv)

    # v3 = v2 @ W1 ; v4 = v3 - 1 ; v5 = relu ; v6 = v5 - 13 ; v7 = relu
    v3 = jnp.dot(v2.astype(jnp.bfloat16), w1_ref[...],
                 preferred_element_type=jnp.float32)
    v5 = jnp.maximum(v3 - 1.0, 0.0)
    v7 = jnp.maximum(v5 - 13.0, 0.0)

    # v8 = tanh ; v9 = v8 + 1
    v9 = jnp.tanh(v7) + 1.0

    # v10 = v9 @ W2 ; v11 = v10 - 0 ; v12 = relu ; v13 = sigmoid
    v10 = jnp.dot(v9.astype(jnp.bfloat16), w2_ref[...],
                  preferred_element_type=jnp.float32)
    v12 = jnp.maximum(v10, 0.0)
    o_ref[...] = jax.nn.sigmoid(v12).astype(o_ref.dtype)


# ------------------------------------------------------------------
# Wrapper: host-side bf16 im2col + block-diag weight prep + one pallas_call.
# ------------------------------------------------------------------
def model_forward(x_nchw, conv_w, conv_b, w1, w2):
    N, Cin, H, W = x_nchw.shape
    KH, KW, _, Cout = conv_w.shape
    D1 = w1.shape[1]
    K = KH * KW * Cin            # 27
    Kp = 32                      # per-block contraction width

    # --- im2col (bf16-early): NCHW -> NHWC, pad spatial by 1, 3x3 patches ---
    x = jnp.transpose(x_nchw, (0, 2, 3, 1)).astype(jnp.bfloat16)       # (N,H,W,Cin)
    x_pad = jnp.pad(x, ((0, 0), (1, 1), (1, 1), (0, 0)))
    cols = [x_pad[:, dy:dy + H, dx:dx + W, :]
            for dy in range(KH) for dx in range(KW)]                    # 9x (N,H,W,Cin)
    M = N * H * W
    patches = jnp.concatenate(cols, axis=-1).reshape(M, K)              # (M,27) bf16

    # bias column (1.0) at index K, zero-pad the rest to Kp.
    a = jnp.concatenate(
        [patches,
         jnp.ones((M, 1), jnp.bfloat16),
         jnp.zeros((M, Kp - K - 1), jnp.bfloat16)], axis=-1)            # (M,32)

    # Conv weight (3,3,Cin,Cout) -> (27,Cout); bias folded into row 27.
    wc = jnp.concatenate(
        [conv_w.reshape(K, Cout).astype(jnp.float32),
         conv_b.reshape(1, Cout).astype(jnp.float32),
         jnp.zeros((Kp - K - 1, Cout), jnp.float32)], axis=0)           # (32,32)
    # W1 cols / W2 rows padded 28 -> 32 (padding cancels exactly, see header).
    w1p = jnp.pad(w1.astype(jnp.float32), ((0, 0), (0, Kp - D1)))       # (32,32)
    w2p = jnp.pad(w2.astype(jnp.float32), ((0, Kp - D1), (0, 0)))       # (32,32)

    # Lane-dense block-diagonal repack: 4 copies of each 32x32 on the diagonal.
    eye = jnp.eye(PACK, dtype=jnp.float32)
    wc_bd = jnp.kron(eye, wc).astype(jnp.bfloat16)                      # (128,128)
    w1_bd = jnp.kron(eye, w1p).astype(jnp.bfloat16)
    w2_bd = jnp.kron(eye, w2p).astype(jnp.bfloat16)

    # --- tile selection over packed (128-lane) rows ---
    Mp_min = pl.cdiv(M, PACK)
    # big tiles, but >= 2 grid steps (v7x megacore) when enough rows exist
    g = max(pl.cdiv(Mp_min, MAX_TM), 2 if Mp_min >= 16 else 1)
    tm = _round_up(pl.cdiv(Mp_min, g), 8)
    Mp = g * tm
    M_pad = Mp * PACK

    a = jnp.pad(a, ((0, M_pad - M), (0, 0)))
    lanes = PACK * Kp                                                   # 128
    a_packed = a.reshape(Mp, lanes)                                     # (Mp,128) bf16

    flops = 3 * 2 * Mp * lanes * lanes
    bytes_accessed = (a_packed.size + wc_bd.size + w1_bd.size + w2_bd.size) * 2 \
                     + Mp * lanes * 2

    out_packed = pl.pallas_call(
        fused_model_kernel,
        out_shape=jax.ShapeDtypeStruct((Mp, lanes), jnp.bfloat16),
        grid=(g,),
        in_specs=[
            pl.BlockSpec((tm, lanes), lambda i: (i, 0)),
            pl.BlockSpec((lanes, lanes), lambda i: (0, 0)),
            pl.BlockSpec((lanes, lanes), lambda i: (0, 0)),
            pl.BlockSpec((lanes, lanes), lambda i: (0, 0)),
        ],
        out_specs=pl.BlockSpec((tm, lanes), lambda i: (i, 0)),
        compiler_params=pltpu.CompilerParams(
            dimension_semantics=("parallel",)),
        cost_estimate=pl.CostEstimate(
            flops=flops,
            transcendentals=3 * Mp * lanes,
            bytes_accessed=bytes_accessed),
    )(a_packed, wc_bd, w1_bd, w2_bd)

    # unpack (free row-major reshape) and drop the padded tail rows
    return out_packed.reshape(M_pad, Kp)[:M]


if __name__ == "__main__":
    # Small deterministic shapes consistent with Conv2d(3, 32, 3, 1, 1):
    # batch=2, Cin=3, spatial=28x28 (as in the original x1), Cout=32.
    N, Cin, H, W = 2, 3, 28, 28
    Cout, D1 = 32, 28

    key = jax.random.PRNGKey(0)
    kx, kw, kb, k1, k2 = jax.random.split(key, 5)

    x = jax.random.normal(kx, (N, Cin, H, W), dtype=jnp.float32)

    # Conv2d(3, 32, 3) parameters (kaiming-ish scale), stored HWIO.
    fan_in = Cin * 3 * 3
    conv_w = jax.random.normal(kw, (3, 3, Cin, Cout), dtype=jnp.float32) / jnp.sqrt(fan_in)
    conv_b = jax.random.normal(kb, (Cout,), dtype=jnp.float32) * 0.01

    # The torch.randn weights created inside forward(), made deterministic.
    w1 = jax.random.normal(k1, (Cout, D1), dtype=jnp.float32)   # torch.randn(32, 28)
    w2 = jax.random.normal(k2, (D1, Cout), dtype=jnp.float32)   # stand-in for torch.randn(10, 32)

    out = jax.block_until_ready(jax.jit(model_forward)(x, conv_w, conv_b, w1, w2))
    assert out.shape == (N * H * W, Cout)
    assert bool(jnp.all(jnp.isfinite(out.astype(jnp.float32))))
    print("KERNEL_OK")
</pallas_src>

<mosaic_0001>
module attributes {stable_mosaic.version = 11 : i64} {
  func.func @fused_model_kernel(%arg0: i32, %arg1: memref<200x128xbf16, #tpu.memory_space<vmem>>, %arg2: memref<128x128xbf16, #tpu.memory_space<vmem>>, %arg3: memref<128x128xbf16, #tpu.memory_space<vmem>>, %arg4: memref<128x128xbf16, #tpu.memory_space<vmem>>, %arg5: memref<200x128xbf16, #tpu.memory_space<vmem>>) attributes {dimension_semantics = [#tpu.dimension_semantics<parallel>], iteration_bounds = array<i64: 2>, scalar_prefetch = 0 : i64, scratch_operands = 0 : i64, tpu.core_type = #tpu.core_type<tc>, window_params = [{transform_indices = @transform_0, window_bounds = array<i64: 200, 128>}, {pipeline_mode = #tpu.pipeline_mode<synchronous>, transform_indices = @transform_1, window_bounds = array<i64: 128, 128>}, {pipeline_mode = #tpu.pipeline_mode<synchronous>, transform_indices = @transform_2, window_bounds = array<i64: 128, 128>}, {pipeline_mode = #tpu.pipeline_mode<synchronous>, transform_indices = @transform_3, window_bounds = array<i64: 128, 128>}, {transform_indices = @transform_4, window_bounds = array<i64: 200, 128>}]} {
    %c0 = arith.constant 0 : index
    %c0_0 = arith.constant 0 : index
    %0 = vector.load %arg1[%c0, %c0_0] : memref<200x128xbf16, #tpu.memory_space<vmem>>, vector<200x128xbf16>
    %c0_1 = arith.constant 0 : index
    %c0_2 = arith.constant 0 : index
    %1 = vector.load %arg2[%c0_1, %c0_2] : memref<128x128xbf16, #tpu.memory_space<vmem>>, vector<128x128xbf16>
    %cst = arith.constant dense<0.000000e+00> : vector<200x128xf32>
    %2 = tpu.matmul %0, %1, %cst {dimension_numbers = #tpu.dot_dimension_numbers<[1], [0], [0], [1], [0, 0, 1, 1], [], []>} : vector<200x128xbf16>, vector<128x128xbf16>, vector<200x128xf32> -> vector<200x128xf32>
    %3 = arith.negf %2 : vector<200x128xf32>
    %4 = math.exp %3 : vector<200x128xf32>
    %cst_3 = arith.constant 1.000000e+00 : f32
    %5 = vector.broadcast %cst_3 : f32 to vector<200x128xf32>
    %6 = arith.addf %5, %4 : vector<200x128xf32>
    %7 = arith.divf %5, %6 : vector<200x128xf32>
    %8 = arith.truncf %7 : vector<200x128xf32> to vector<200x128xbf16>
    %c0_4 = arith.constant 0 : index
    %c0_5 = arith.constant 0 : index
    %9 = vector.load %arg3[%c0_4, %c0_5] : memref<128x128xbf16, #tpu.memory_space<vmem>>, vector<128x128xbf16>
    %cst_6 = arith.constant dense<0.000000e+00> : vector<200x128xf32>
    %10 = tpu.matmul %8, %9, %cst_6 {dimension_numbers = #tpu.dot_dimension_numbers<[1], [0], [0], [1], [0, 0, 1, 1], [], []>} : vector<200x128xbf16>, vector<128x128xbf16>, vector<200x128xf32> -> vector<200x128xf32>
    %cst_7 = arith.constant 1.000000e+00 : f32
    %11 = vector.broadcast %cst_7 : f32 to vector<200x128xf32>
    %12 = arith.subf %10, %11 : vector<200x128xf32>
    %cst_8 = arith.constant 0.000000e+00 : f32
    %13 = vector.broadcast %cst_8 : f32 to vector<200x128xf32>
    %14 = arith.maximumf %12, %13 : vector<200x128xf32>
    %cst_9 = arith.constant 1.300000e+01 : f32
    %15 = vector.broadcast %cst_9 : f32 to vector<200x128xf32>
    %16 = arith.subf %14, %15 : vector<200x128xf32>
    %cst_10 = arith.constant 0.000000e+00 : f32
    %17 = vector.broadcast %cst_10 : f32 to vector<200x128xf32>
    %18 = arith.maximumf %16, %17 : vector<200x128xf32>
    %19 = math.tanh %18 : vector<200x128xf32>
    %cst_11 = arith.constant 1.000000e+00 : f32
    %20 = vector.broadcast %cst_11 : f32 to vector<200x128xf32>
    %21 = arith.addf %19, %20 : vector<200x128xf32>
    %22 = arith.truncf %21 : vector<200x128xf32> to vector<200x128xbf16>
    %c0_12 = arith.constant 0 : index
    %c0_13 = arith.constant 0 : index
    %23 = vector.load %arg4[%c0_12, %c0_13] : memref<128x128xbf16, #tpu.memory_space<vmem>>, vector<128x128xbf16>
    %cst_14 = arith.constant dense<0.000000e+00> : vector<200x128xf32>
    %24 = tpu.matmul %22, %23, %cst_14 {dimension_numbers = #tpu.dot_dimension_numbers<[1], [0], [0], [1], [0, 0, 1, 1], [], []>} : vector<200x128xbf16>, vector<128x128xbf16>, vector<200x128xf32> -> vector<200x128xf32>
    %cst_15 = arith.constant 0.000000e+00 : f32
    %25 = vector.broadcast %cst_15 : f32 to vector<200x128xf32>
    %26 = arith.maximumf %24, %25 : vector<200x128xf32>
    %27 = arith.negf %26 : vector<200x128xf32>
    %28 = math.exp %27 : vector<200x128xf32>
    %cst_16 = arith.constant 1.000000e+00 : f32
    %29 = vector.broadcast %cst_16 : f32 to vector<200x128xf32>
    %30 = arith.addf %29, %28 : vector<200x128xf32>
    %31 = arith.divf %29, %30 : vector<200x128xf32>
    %32 = arith.truncf %31 : vector<200x128xf32> to vector<200x128xbf16>
    %c0_17 = arith.constant 0 : index
    %c0_18 = arith.constant 0 : index
    %33 = vector.load %arg5[%c0_17, %c0_18] : memref<200x128xbf16, #tpu.memory_space<vmem>>, vector<200x128xbf16>
    tpu.vector_store %arg5[%c0_17, %c0_18], %32 {strides = array<i32>} : memref<200x128xbf16, #tpu.memory_space<vmem>>, vector<200x128xbf16>,
    return
  }
  func.func @transform_0(%arg0: i32) -> (i32, i32) {
    %c0_i32 = arith.constant 0 : i32
    %c0_i32_0 = arith.constant 0 : i32
    return %arg0, %c0_i32 : i32, i32
  }
  func.func @transform_1(%arg0: i32) -> (i32, i32) {
    %c0_i32 = arith.constant 0 : i32
    %c0_i32_0 = arith.constant 0 : i32
    %c0_i32_1 = arith.constant 0 : i32
    return %c0_i32, %c0_i32_0 : i32, i32
  }
  func.func @transform_2(%arg0: i32) -> (i32, i32) {
    %c0_i32 = arith.constant 0 : i32
    %c0_i32_0 = arith.constant 0 : i32
    %c0_i32_1 = arith.constant 0 : i32
    return %c0_i32, %c0_i32_0 : i32, i32
  }
  func.func @transform_3(%arg0: i32) -> (i32, i32) {
    %c0_i32 = arith.constant 0 : i32
    %c0_i32_0 = arith.constant 0 : i32
    %c0_i32_1 = arith.constant 0 : i32
    return %c0_i32, %c0_i32_0 : i32, i32
  }
  func.func @transform_4(%arg0: i32) -> (i32, i32) {
    %c0_i32 = arith.constant 0 : i32
    %c0_i32_0 = arith.constant 0 : i32
    return %arg0, %c0_i32 : i32, i32
  }
}

</mosaic_0001>

<bundles_post_ra>
// kernel: model_forward.1
= control target key start
LH: loop header
LB: loop body
LE: loop exit
PB: predicated region body
PF: predicated region fallthrough
CT: control target
= control target key end

     0   :  { %s2468_s15 = smov 0   ;;  %s2731_s0 = inlined_call_operand.vmem [shape: bf16[400,128], index: 0, kind: input, shape index: {}]   ;;  %s2732_s1 = inlined_call_operand.vmem [shape: bf16[128,128], index: 1, kind: input, shape index: {}]   ;;  %s2733_s2 = inlined_call_operand.vmem [shape: bf16[128,128], index: 2, kind: input, shape index: {}]   ;;  %s2734_s3 = inlined_call_operand.vmem [shape: bf16[128,128], index: 3, kind: input, shape index: {}]   ;;  %s2735_s4 = inlined_call_operand.vmem [shape: bf16[400,128], index: 4, kind: output, shape index: {}]  }
   0x1 LB: > { %s1586_s16 = sadd.s32 4294967295, %s2439_s15   ;;  %p1590_p0 = scmp.ge.s32.totalorder %s2439_s15, 1  ;;  %s2439_s15 = sphi %s2468_s15, %s14_s15  }
   0x2   : > { %p163_p1 = scmp.lt.s32.totalorder %s2439_s15, 3 }
   0x4   : > { %p164_p2 = pnand %p1590_p0, %p163_p1 }
   0x5   : > { %v2146_v0 = vld [vmem:[%s2732_s1] sm:$0xff] (!%p164_p2)   ;;  %v2441_v1 = vmov (!%p164_p2), 0.0   ;;  %v2147_v2 = vld [vmem:[%s2732_s1 + $0x8] sm:$0xff] (!%p164_p2)   ;;  %vm2442_vm0 = vmmov (!%p164_p2), 0   ;;  %s189_s21 = smul.u32 (!%p164_p2), 25, %s1586_s16  ;;  %v2148_v3 = vld [vmem:[%s2732_s1 + $0x10] sm:$0xff] (!%p164_p2)  }
   0x6   : > { %167 = sbr.rel (%p164_p2) target bundleno = 858 (0x35a), region = 36  ;;  %1916 = vmatprep.subr.bf16.mxu0 (!%p164_p2), %v2441_v1  ;;  %2120 = vmatprep.subr.bf16.mxu1 (!%p164_p2), %v2441_v1  ;;  %v2149_v4 = vld [vmem:[%s2732_s1 + $0x18] sm:$0xff] (!%p164_p2)   ;;  %v2150_v5 = vld [vmem:[%s2732_s1 + $0x20] sm:$0xff] (!%p164_p2)   ;;  %v2151_v6 = vld [vmem:[%s2732_s1 + $0x28] sm:$0xff] (!%p164_p2)  }
   0x7   : > { %1917 = vmatpush3.bf16.msra.mxu0 (!%p164_p2), %v2146_v0  ;;  %1932 = vmatprep.mubr.msk.bf16.mxu0 (!%p164_p2), %vm2442_vm0, %v2441_v1  ;;  %p190_p3 = scmp.lt.s32.totalorder (!%p164_p2), %s189_s21, 49  ;;  %v2152_v7 = vld [vmem:[%s2732_s1 + $0x30] sm:$0xff] (!%p164_p2)   ;;  %v2153_v8 = vld [vmem:[%s2732_s1 + $0x38] sm:$0xff] (!%p164_p2)   ;;  %v2167_v11 = vld [vmem:[%s2733_s2] sm:$0xff] (!%p164_p2)  }
   0x8   : > { %1918 = vmatprep.subr.bf16.mxu0 (!%p164_p2), %v2441_v1  ;;  %2128 = vmatpush3.bf16.msra.mxu1 (!%p164_p2), %v2146_v0  ;;  %v2168_v12 = vld [vmem:[%s2733_s2 + $0x8] sm:$0xff] (!%p164_p2)   ;;  %v2169_v15 = vld [vmem:[%s2733_s2 + $0x10] sm:$0xff] (!%p164_p2)   ;;  %v2170_v25 = vld [vmem:[%s2733_s2 + $0x18] sm:$0xff] (!%p164_p2)  }
   0x9   : > { %2121 = vmatprep.subr.bf16.mxu1 (!%p164_p2), %v2441_v1  ;;  %1960 = vmatprep.mubr.msk.bf16.mxu1 (!%p164_p2), %vm2442_vm0, %v2441_v1  ;;  %v2171_v26 = vld [vmem:[%s2733_s2 + $0x20] sm:$0xff] (!%p164_p2)   ;;  %v2172_v27 = vld [vmem:[%s2733_s2 + $0x28] sm:$0xff] (!%p164_p2)   ;;  %v2173_v28 = vld [vmem:[%s2733_s2 + $0x30] sm:$0xff] (!%p164_p2)  }
   0xa   : > { %v2174_v29 = vld [vmem:[%s2733_s2 + $0x38] sm:$0xff] (!%p164_p2)   ;;  %v2175_v30 = vld [vmem:[%s2734_s3] sm:$0xff] (!%p164_p2)   ;;  %v2176_v35 = vld [vmem:[%s2734_s3 + $0x8] sm:$0xff] (!%p164_p2)  }
   0xb   : > { %1919 = vmatpush3.bf16.msra.mxu0 (!%p164_p2), %v2147_v2  ;;  %v2177_v44 = vld [vmem:[%s2734_s3 + $0x10] sm:$0xff] (!%p164_p2)   ;;  %v2178_v49 = vld [vmem:[%s2734_s3 + $0x18] sm:$0xff] (!%p164_p2)   ;;  %v2179_v59 = vld [vmem:[%s2734_s3 + $0x20] sm:$0xff] (!%p164_p2)  }
   0xc   : > { %1920 = vmatprep.subr.bf16.mxu0 (!%p164_p2), %v2441_v1  ;;  %2129 = vmatpush3.bf16.msra.mxu1 (!%p164_p2), %v2147_v2 }
   0xd   : > { %s2737_s21 = smov (!%p190_p3, %s189_s21), 49  ;;  %2122 = vmatprep.subr.bf16.mxu1 %v2441_v1 }
   0xe   : > { %s1591_s24 = sshll.u32 %s2737_s21, 2 }
   0xf   : > { %s2503_s27 = scalar_lea.vmem %s2731_s0, %s1591_s24  ;;  %1921 = vmatpush3.bf16.msra.mxu0 %v2148_v3  ;;  %s2713_s26 = scalar_lea.vmem %s2735_s4, %s1591_s24 }
  0x10   : > { %1922 = vmatprep.subr.bf16.mxu0 %v2441_v1  ;;  %2130 = vmatpush3.bf16.msra.mxu1 %v2148_v3  ;;  %v2154_v9 = vld [vmem:[%s2503_s27] sm:$0xff]   ;;  %v2161_v10 = vld [vmem:[%s2503_s27 + $0x38] sm:$0xff]   ;;  %v2155_v13 = vld [vmem:[%s2503_s27 + $0x8] sm:$0xff]  }
  0x11   : > { %2123 = vmatprep.subr.bf16.mxu1 %v2441_v1  ;;  %v2162_v14 = vld [vmem:[%s2503_s27 + $0x40] sm:$0xff]   ;;  %v2156_v16 = vld [vmem:[%s2503_s27 + $0x10] sm:$0xff]   ;;  %v2163_v17 = vld [vmem:[%s2503_s27 + $0x48] sm:$0xff]  }
  0x12   : > { %v2157_v18 = vld [vmem:[%s2503_s27 + $0x18] sm:$0xff]   ;;  %v2164_v19 = vld [vmem:[%s2503_s27 + $0x50] sm:$0xff]   ;;  %v2158_v20 = vld [vmem:[%s2503_s27 + $0x20] sm:$0xff]  }
  0x13   : > { %1923 = vmatpush3.bf16.msra.mxu0 %v2149_v4  ;;  %v2165_v21 = vld [vmem:[%s2503_s27 + $0x58] sm:$0xff]   ;;  %v2159_v22 = vld [vmem:[%s2503_s27 + $0x28] sm:$0xff]   ;;  %v2166_v23 = vld [vmem:[%s2503_s27 + $0x60] ss:$0 sps:$4 sm:$0xff]  }
  0x14   : > { %1924 = vmatprep.subr.bf16.mxu0 %v2441_v1  ;;  %2131 = vmatpush3.bf16.msra.mxu1 %v2149_v4  ;;  %v2160_v24 = vld [vmem:[%s2503_s27 + $0x30] sm:$0xff]  }
  0x15   : > { %2124 = vmatprep.subr.bf16.mxu1 %v2441_v1 }
  0x17   : > { %1925 = vmatpush3.bf16.msra.mxu0 %v2150_v5 }
  0x18   : > { %1926 = vmatprep.subr.bf16.mxu0 %v2441_v1  ;;  %2132 = vmatpush3.bf16.msra.mxu1 %v2150_v5 }
  0x19   : > { %2125 = vmatprep.subr.bf16.mxu1 %v2441_v1 }
  0x1b   : > { %1927 = vmatpush3.bf16.msra.mxu0 %v2151_v6 }
  0x1c   : > { %1928 = vmatprep.subr.bf16.mxu0 %v2441_v1  ;;  %2133 = vmatpush3.bf16.msra.mxu1 %v2151_v6 }
  0x1d   : > { %2126 = vmatprep.subr.bf16.mxu1 %v2441_v1 }
  0x1f   : > { %1929 = vmatpush3.bf16.msra.mxu0 %v2152_v7 }
  0x20   : > { %1930 = vmatprep.subr.bf16.mxu0 %v2441_v1  ;;  %2134 = vmatpush3.bf16.msra.mxu1 %v2152_v7 }
  0x21   : > { %2127 = vmatprep.subr.bf16.mxu1 %v2441_v1 }
  0x23   : > { %1931 = vmatpush3.bf16.msra.mxu0 %v2153_v8 }
  0x24   : > { %2135 = vmatpush3.bf16.msra.mxu1 %v2153_v8  ;;  %2052 = vmatprep.subr.bf16.mxu0 %v2441_v1 }
  0x25   : > { %1984 = vmatprep.subr.bf16.mxu1 %v2441_v1 }
  0x26   : > { %1933 = vmatmul.mubr.bf16.vlgmr.msra.gmra.mrb[0].mxu0 %v2154_v9 }
  0x27   : > { %1936 = vmatprep.mubr.msk.bf16.mxu0 %vm2442_vm0, %v2441_v1  ;;  %1961 = vmatmul.mubr.bf16.vlgmr.msra.gmra.mrb[0].mxu1 %v2161_v10 }
  0x28   : > { %1964 = vmatprep.mubr.msk.bf16.mxu1 %vm2442_vm0, %v2441_v1  ;;  %1985 = vmatpush3.bf16.msra.mxu1 %v2167_v11 }
  0x29   : > { %1986 = vmatprep.subr.bf16.mxu1 %v2441_v1  ;;  %2053 = vmatpush3.bf16.msra.mxu0 %v2175_v30 }
  0x2a   : > { %2054 = vmatprep.subr.bf16.mxu0 %v2441_v1 }
  0x2c   : > { %1987 = vmatpush3.bf16.msra.mxu1 %v2168_v12 }
  0x2d   : > { %1988 = vmatprep.subr.bf16.mxu1 %v2441_v1  ;;  %2055 = vmatpush3.bf16.msra.mxu0 %v2176_v35 }
  0x2e   : > { %1937 = vmatmul.mubr.bf16.gmra.mrb[4].mxu0 %v2155_v13  ;;  %2056 = vmatprep.subr.bf16.mxu0 %v2441_v1 }
  0x2f   : > { %1940 = vmatprep.mubr.msk.bf16.mxu0 %vm2442_vm0, %v2441_v1  ;;  %1965 = vmatmul.mubr.bf16.gmra.mrb[4].mxu1 %v2162_v14 }
  0x30   : > { %1968 = vmatprep.mubr.msk.bf16.mxu1 %vm2442_vm0, %v2441_v1  ;;  %1989 = vmatpush3.bf16.msra.mxu1 %v2169_v15 }
  0x31   : > { %1990 = vmatprep.subr.bf16.mxu1 %v2441_v1  ;;  %2057 = vmatpush3.bf16.msra.mxu0 %v2177_v44 }
  0x32   : > { %2058 = vmatprep.subr.bf16.mxu0 %v2441_v1 }
  0x34   : > { %1991 = vmatpush3.bf16.msra.mxu1 %v2170_v25 }
  0x35   : > { %1992 = vmatprep.subr.bf16.mxu1 %v2441_v1  ;;  %2059 = vmatpush3.bf16.msra.mxu0 %v2178_v49 }
  0x36   : > { %1941 = vmatmul.mubr.bf16.gmra.mrb[8].mxu0 %v2156_v16  ;;  %2060 = vmatprep.subr.bf16.mxu0 %v2441_v1 }
  0x37   : > { %1944 = vmatprep.mubr.msk.bf16.mxu0 %vm2442_vm0, %v2441_v1  ;;  %1969 = vmatmul.mubr.bf16.gmra.mrb[8].mxu1 %v2163_v17 }
  0x38   : > { %1972 = vmatprep.mubr.msk.bf16.mxu1 %vm2442_vm0, %v2441_v1  ;;  %1993 = vmatpush3.bf16.msra.mxu1 %v2171_v26 }
  0x39   : > { %1994 = vmatprep.subr.bf16.mxu1 %v2441_v1  ;;  %2061 = vmatpush3.bf16.msra.mxu0 %v2179_v59 }
  0x3a   : > { %2062 = vmatprep.subr.bf16.mxu0 %v2441_v1 }
  0x3c   : > { %1995 = vmatpush3.bf16.msra.mxu1 %v2172_v27 }
  0x3d   : > { %1996 = vmatprep.subr.bf16.mxu1 %v2441_v1 }
  0x3e   : > { %1945 = vmatmul.mubr.bf16.gmra.mrb[12].mxu0 %v2157_v18 }
  0x3f   : > { %1948 = vmatprep.mubr.msk.bf16.mxu0 %vm2442_vm0, %v2441_v1  ;;  %1973 = vmatmul.mubr.bf16.gmra.mrb[12].mxu1 %v2164_v19 }
  0x40   : > { %1976 = vmatprep.mubr.msk.bf16.mxu1 %vm2442_vm0, %v2441_v1  ;;  %1997 = vmatpush3.bf16.msra.mxu1 %v2173_v28 }
  0x41   : > { %1998 = vmatprep.subr.bf16.mxu1 %v2441_v1 }
  0x44   : > { %1999 = vmatpush3.bf16.msra.mxu1 %v2174_v29 }
  0x46   : > { %1949 = vmatmul.mubr.bf16.gmra.mrb[16].mxu0 %v2158_v20 }
  0x47   : > { %1952 = vmatprep.mubr.msk.bf16.mxu0 %vm2442_vm0, %v2441_v1  ;;  %1977 = vmatmul.mubr.bf16.gmra.mrb[16].mxu1 %v2165_v21 }
  0x48   : > { %1980 = vmatprep.mubr.msk.bf16.mxu1 %vm2442_vm0, %v2441_v1 }
  0x4e   : > { %1953 = vmatmul.mubr.bf16.gmra.mrb[20].mxu0 %v2159_v22 }
  0x4f   : > { %1956 = vmatprep.mubr.msk.bf16.mxu0 %vm2442_vm0, %v2441_v1  ;;  %1981 = vmatmul.mubr.bf16.gmra.mrb[20].mxu1 %v2166_v23 }
  0x50   : > { %2000 = vmatprep.mubr.msk.bf16.mxu1 %vm2442_vm0, %v2441_v1 }
  0x56   : > { %1957 = vmatmul.mubr.bf16.gmra.mrb[24].mxu0 %v2160_v24 }
  0x57   : > { %2068 = vmatprep.mubr.msk.bf16.mxu0 %vm2442_vm0, %v2441_v1 }
  0xf9   : > { %v401_v31 = vpop.f32.mrb[0].mxu0 }
  0xfa   : > { %v1614_v32 = vmul.f32 -1.442695, %v401_v31  ;;  %v1934_v33 = vpop.f32.mrb[1].mxu0  ;;  %v457_v34 = vpop.f32.mrb[0].mxu1 }
  0xfb   : > { %v404_v36 = vpop.f32.mrb[2].mxu0  ;;  %v1628_v37 = vmul.f32 -1.442695, %v457_v34  ;;  %v1962_v38 = vpop.f32.mrb[1].mxu1 }
  0xfc   : > { %2183 = vpow2.f32 %v1614_v32  ;;  %v1615_v39 = vmul.f32 -1.442695, %v404_v36  ;;  %v1935_v40 = vpop.f32.mrb[3].mxu0  ;;  %v460_v41 = vpop.f32.mrb[2].mxu1 }
  0xfd   : > { %2185 = vpow2.f32 %v1628_v37  ;;  %v1629_v42 = vmul.f32 -1.442695, %v460_v41  ;;  %v1963_v43 = vpop.f32.mrb[3].mxu1 }
  0xfe   : > { %2187 = vpow2.f32 %v1615_v39 }
  0xff   : > { %2189 = vpow2.f32 %v1629_v42 }
 0x101   : > { %v409_v45 = vpop.f32.mrb[4].mxu0 }
 0x102   : > { %v1616_v46 = vmul.f32 -1.442695, %v409_v45  ;;  %v1938_v47 = vpop.f32.mrb[5].mxu0  ;;  %v465_v48 = vpop.f32.mrb[4].mxu1 }
 0x103   : > { %v412_v50 = vpop.f32.mrb[6].mxu0  ;;  %v1630_v51 = vmul.f32 -1.442695, %v465_v48  ;;  %v1966_v52 = vpop.f32.mrb[5].mxu1 }
 0x104   : > { %2191 = vpow2.f32 %v1616_v46  ;;  %v1617_v53 = vmul.f32 -1.442695, %v412_v50  ;;  %v1939_v54 = vpop.f32.mrb[7].mxu0  ;;  %v468_v55 = vpop.f32.mrb[6].mxu1 }
 0x105   : > { %2193 = vpow2.f32 %v1630_v51  ;;  %v1631_v56 = vmul.f32 -1.442695, %v468_v55  ;;  %v1967_v57 = vpop.f32.mrb[7].mxu1 }
 0x106   : > { %v2184_v58 = vpop.eup %2183  ;;  %2195 = vpow2.f32 %v1617_v53 }
 0x107   : > { %v2186_v60 = vpop.eup %2185  ;;  %v578_v61 = vadd.f32 1.0, %v2184_v58  ;;  %2197 = vpow2.f32 %v1631_v56 }
 0x108   : > { %v2188_v62 = vpop.eup %2187  ;;  %v592_v63 = vadd.f32 1.0, %v2186_v60 }
 0x109   : > { %v2190_v0 = vpop.eup %2189  ;;  %2199 = vrcp.f32 %v578_v61  ;;  %v579_v2 = vadd.f32 1.0, %v2188_v62  ;;  %v417_v3 = vpop.f32.mrb[8].mxu0 }
 0x10a   : > { %v1618_v4 = vmul.f32 -1.442695, %v417_v3  ;;  %v1942_v5 = vpop.f32.mrb[9].mxu0  ;;  %2201 = vrcp.f32 %v592_v63  ;;  %v593_v6 = vadd.f32 1.0, %v2190_v0  ;;  %v473_v7 = vpop.f32.mrb[8].mxu1 }
 0x10b   : > { %2203 = vrcp.f32 %v579_v2  ;;  %v420_v8 = vpop.f32.mrb[10].mxu0  ;;  %v1632_v9 = vmul.f32 -1.442695, %v473_v7  ;;  %v1970_v10 = vpop.f32.mrb[9].mxu1 }
 0x10c   : > { %2205 = vpow2.f32 %v1618_v4  ;;  %v1619_v11 = vmul.f32 -1.442695, %v420_v8  ;;  %v1943_v12 = vpop.f32.mrb[11].mxu0  ;;  %v476_v13 = vpop.f32.mrb[10].mxu1 }
 0x10d   : > { %2207 = vrcp.f32 %v593_v6  ;;  %v1633_v14 = vmul.f32 -1.442695, %v476_v13  ;;  %v1971_v15 = vpop.f32.mrb[11].mxu1 }
 0x10e   : > { %v2192_v16 = vpop.eup %2191  ;;  %2209 = vpow2.f32 %v1619_v11 }
 0x10f   : > { %v2194_v17 = vpop.eup %2193  ;;  %v580_v18 = vadd.f32 1.0, %v2192_v16  ;;  %2211 = vpow2.f32 %v1632_v9 }
 0x110   : > { %v2196_v19 = vpop.eup %2195  ;;  %v594_v20 = vadd.f32 1.0, %v2194_v17  ;;  %2213 = vpow2.f32 %v1633_v14 }
 0x111   : > { %v2198_v21 = vpop.eup %2197  ;;  %2215 = vrcp.f32 %v580_v18  ;;  %v581_v22 = vadd.f32 1.0, %v2196_v19  ;;  %v425_v23 = vpop.f32.mrb[12].mxu0 }
 0x112   : > { %v1620_v24 = vmul.f32 -1.442695, %v425_v23  ;;  %v1946_v25 = vpop.f32.mrb[13].mxu0  ;;  %2217 = vrcp.f32 %v594_v20  ;;  %v595_v26 = vadd.f32 1.0, %v2198_v21  ;;  %v481_v27 = vpop.f32.mrb[12].mxu1 }
 0x113   : > { %v2200_v28 = vpop.eup %2199  ;;  %2219 = vrcp.f32 %v581_v22  ;;  %v428_v29 = vpop.f32.mrb[14].mxu0  ;;  %v1634_v30 = vmul.f32 -1.442695, %v481_v27 }
 0x114   : > { %v1974_v31 = vpop.f32.mrb[13].mxu1  ;;  %v2622_v32 = vpop.eup %2201  ;;  %2221 = vpow2.f32 %v1620_v24  ;;  %v1621_v33 = vmul.f32 -1.442695, %v428_v29 }
 0x115   : > { %v1947_v34 = vpop.f32.mrb[15].mxu0  ;;  %v484_v35 = vpop.f32.mrb[14].mxu1  ;;  %2223 = vrcp.f32 %v595_v26 }
 0x116   : > { %v2204_v36 = vpop.eup %2203  ;;  %v1635_v37 = vmul.f32 -1.442695, %v484_v35  ;;  %v1975_v38 = vpop.f32.mrb[15].mxu1  ;;  %2225 = vpow2.f32 %v1621_v33 }
 0x117   : > { %v2206_v39 = vpop.eup %2205  ;;  %v653_v40 = vpack.c.bf16 %v2204_v36, %v2200_v28  ;;  %2227 = vpow2.f32 %v1634_v30 }
 0x118   : > { %v2624_v41 = vpop.eup %2207  ;;  %v582_v42 = vadd.f32 1.0, %v2206_v39  ;;  %2229 = vpow2.f32 %v1635_v37 }
 0x119   : > { %v2210_v43 = vpop.eup %2209  ;;  %2001 = vmatmul.mubr.bf16.vlgmr.msra.gmra.mrb[24].mxu1 %v653_v40  ;;  %v660_v44 = vpack.c.bf16 %v2624_v41, %v2622_v32  ;;  %v433_v47 = vpop.f32.mrb[16].mxu0 }
 0x11a   : > { %v2212_v45 = vpop.eup %2211  ;;  %v583_v46 = vadd.f32 1.0, %v2210_v43  ;;  %2004 = vmatprep.mubr.msk.bf16.mxu1 %vm2442_vm0, %v2441_v1  ;;  %2231 = vrcp.f32 %v582_v42  ;;  %v1622_v49 = vmul.f32 -1.442695, %v433_v47  ;;  %v1950_v50 = vpop.f32.mrb[17].mxu0 }
 0x11b   : > { %v2214_v48 = vpop.eup %2213  ;;  %v596_v51 = vadd.f32 1.0, %v2212_v45  ;;  %v489_v52 = vpop.f32.mrb[16].mxu1 }
 0x11c   : > { %v2216_v53 = vpop.eup %2215  ;;  %2233 = vrcp.f32 %v583_v46  ;;  %v436_v54 = vpop.f32.mrb[18].mxu0  ;;  %v597_v55 = vadd.f32 1.0, %v2214_v48  ;;  %v1636_v60 = vmul.f32 -1.442695, %v489_v52 }
 0x11d   : > { %v1978_v56 = vpop.f32.mrb[17].mxu1  ;;  %v2630_v57 = vpop.eup %2217  ;;  %2235 = vpow2.f32 %v1622_v49  ;;  %v1623_v58 = vmul.f32 -1.442695, %v436_v54 }
 0x11e   : > { %v1951_v59 = vpop.f32.mrb[19].mxu0  ;;  %v492_v61 = vpop.f32.mrb[18].mxu1  ;;  %2237 = vrcp.f32 %v596_v51 }
 0x11f   : > { %v2220_v62 = vpop.eup %2219  ;;  %v1979_v63 = vpop.f32.mrb[19].mxu1  ;;  %2239 = vpow2.f32 %v1623_v58  ;;  %v1637_v3 = vmul.f32 -1.442695, %v492_v61 }
 0x120   : > { %v2222_v0 = vpop.eup %2221  ;;  %v654_v2 = vpack.c.bf16 %v2220_v62, %v2216_v53  ;;  %2241 = vrcp.f32 %v597_v55 }
 0x121   : > { %v2632_v4 = vpop.eup %2223  ;;  %v584_v5 = vadd.f32 1.0, %v2222_v0  ;;  %2243 = vpow2.f32 %v1636_v60  ;;  %v441_v10 = vpop.f32.mrb[20].mxu0 }
 0x122   : > { %v2226_v6 = vpop.eup %2225  ;;  %2005 = vmatmul.mubr.bf16.gmra.mrb[28].mxu1 %v654_v2  ;;  %v661_v7 = vpack.c.bf16 %v2632_v4, %v2630_v57  ;;  %v1624_v12 = vmul.f32 -1.442695, %v441_v10  ;;  %v1954_v13 = vpop.f32.mrb[21].mxu0  ;;  %v2180_v57 = vld [vmem:[%s2734_s3 + $0x28] sm:$0xff]   ;;  %v2181_v4 = vld [vmem:[%s2734_s3 + $0x30] sm:$0xff]  }
 0x123   : > { %v2228_v8 = vpop.eup %2227  ;;  %2245 = vrcp.f32 %v584_v5  ;;  %v585_v9 = vadd.f32 1.0, %v2226_v6  ;;  %2008 = vmatprep.mubr.msk.bf16.mxu1 %vm2442_vm0, %v2441_v1  ;;  %v2638_v15 = vpop.f32.mrb[20].mxu1  ;;  %2063 = vmatpush3.bf16.msra.mxu0 %v2180_v57 }
 0x124   : > { %v2230_v11 = vpop.eup %2229  ;;  %v598_v14 = vadd.f32 1.0, %v2228_v8  ;;  %2247 = vpow2.f32 %v1637_v3  ;;  %v444_v16 = vpop.f32.mrb[22].mxu0  ;;  %2064 = vmatprep.subr.bf16.mxu0 %v2441_v1 }
 0x125   : > { %2249 = vrcp.f32 %v585_v9  ;;  %v599_v17 = vadd.f32 1.0, %v2230_v11  ;;  %v1982_v18 = vpop.f32.mrb[21].mxu1  ;;  %v2232_v19 = vpop.eup %2231  ;;  %v1625_v20 = vmul.f32 -1.442695, %v444_v16 }
 0x126   : > { %2251 = vpow2.f32 %v1624_v12  ;;  %v1955_v21 = vpop.f32.mrb[23].mxu0  ;;  %v500_v22 = vpop.f32.mrb[22].mxu1  ;;  %v1638_v12 = vmul.f32 -1.442695, %v2638_v15 }
 0x127   : > { %v2234_v23 = vpop.eup %2233  ;;  %2253 = vrcp.f32 %v598_v14  ;;  %v1983_v24 = vpop.f32.mrb[23].mxu1  ;;  %2065 = vmatpush3.bf16.msra.mxu0 %v2181_v4 }
 0x128   : > { %v2236_v25 = vpop.eup %2235  ;;  %2255 = vpow2.f32 %v1625_v20  ;;  %v655_v26 = vpack.c.bf16 %v2234_v23, %v2232_v19  ;;  %2066 = vmatprep.subr.bf16.mxu0 %v2441_v1 }
 0x129   : > { %v2640_v27 = vpop.eup %2237  ;;  %v586_v28 = vadd.f32 1.0, %v2236_v25  ;;  %2257 = vrcp.f32 %v599_v17  ;;  %v449_v33 = vpop.f32.mrb[24].mxu0 }
 0x12a   : > { %v2240_v29 = vpop.eup %2239  ;;  %2009 = vmatmul.mubr.bf16.gmra.mrb[32].mxu1 %v655_v26  ;;  %v1626_v35 = vmul.f32 -1.442695, %v449_v33  ;;  %v1958_v36 = vpop.f32.mrb[25].mxu0 }
 0x12b   : > { %v2642_v30 = vpop.eup %2241  ;;  %v587_v31 = vadd.f32 1.0, %v2240_v29  ;;  %2012 = vmatprep.mubr.msk.bf16.mxu1 %vm2442_vm0, %v2441_v1  ;;  %2259 = vrcp.f32 %v586_v28  ;;  %v452_v39 = vpop.f32.mrb[26].mxu0 }
 0x12c   : > { %v2244_v34 = vpop.eup %2243  ;;  %v662_v37 = vpack.c.bf16 %v2642_v30, %v2640_v27  ;;  %v1627_v43 = vmul.f32 -1.442695, %v452_v39  ;;  %v1959_v45 = vpop.f32.mrb[27].mxu0 }
 0x12d   : > { %v2246_v38 = vpop.eup %2245  ;;  %2261 = vrcp.f32 %v587_v31  ;;  %v600_v40 = vadd.f32 1.0, %v2244_v34 }
 0x12e   : > { %v2248_v42 = vpop.eup %2247  ;;  %2263 = vpow2.f32 %v1626_v35 }
 0x12f   : > { %v2250_v46 = vpop.eup %2249  ;;  %2265 = vrcp.f32 %v600_v40  ;;  %v601_v47 = vadd.f32 1.0, %v2248_v42 }
 0x130   : > { %v2252_v48 = vpop.eup %2251  ;;  %2267 = vpow2.f32 %v1627_v43  ;;  %v656_v49 = vpack.c.bf16 %v2250_v46, %v2246_v38 }
 0x131   : > { %v2254_v50 = vpop.eup %2253  ;;  %v588_v51 = vadd.f32 1.0, %v2252_v48  ;;  %2269 = vrcp.f32 %v601_v47 }
 0x132   : > { %v2256_v52 = vpop.eup %2255  ;;  %2013 = vmatmul.mubr.bf16.gmra.mrb[36].mxu1 %v656_v49 }
 0x133   : > { %v2258_v53 = vpop.eup %2257  ;;  %v589_v54 = vadd.f32 1.0, %v2256_v52  ;;  %2016 = vmatprep.mubr.msk.bf16.mxu1 %vm2442_vm0, %v2441_v1  ;;  %2271 = vrcp.f32 %v588_v51 }
 0x134   : > { %v663_v55 = vpack.c.bf16 %v2258_v53, %v2254_v50 }
 0x135   : > { %2273 = vrcp.f32 %v589_v54  ;;  %v2260_v56 = vpop.eup %2259 }
 0x137   : > { %v2262_v58 = vpop.eup %2261 }
 0x138   : > { %v2264_v59 = vpop.eup %2263  ;;  %v657_v60 = vpack.c.bf16 %v2262_v58, %v2260_v56 }
 0x139   : > { %v2266_v61 = vpop.eup %2265  ;;  %v590_v62 = vadd.f32 1.0, %v2264_v59 }
 0x13a   : > { %v2268_v63 = vpop.eup %2267  ;;  %2017 = vmatmul.mubr.bf16.gmra.mrb[40].mxu1 %v657_v60 }
 0x13b   : > { %v2270_v0 = vpop.eup %2269  ;;  %v591_v2 = vadd.f32 1.0, %v2268_v63  ;;  %2020 = vmatprep.mubr.msk.bf16.mxu1 %vm2442_vm0, %v2441_v1  ;;  %2275 = vrcp.f32 %v590_v62 }
 0x13c   : > { %v664_v3 = vpack.c.bf16 %v2270_v0, %v2266_v61 }
 0x13d   : > { %2277 = vrcp.f32 %v591_v2  ;;  %v2272_v5 = vpop.eup %2271 }
 0x13e   : > { %2279 = vpow2.f32 %v1638_v12 }
 0x13f   : > { %v2274_v6 = vpop.eup %2273 }
 0x140   : > { %v658_v8 = vpack.c.bf16 %v2274_v6, %v2272_v5 }
 0x142   : > { %2021 = vmatmul.mubr.bf16.gmra.mrb[44].mxu1 %v658_v8 }
 0x143   : > { %2024 = vmatprep.mubr.msk.bf16.mxu1 %vm2442_vm0, %v2441_v1 }
 0x145   : > { %v2276_v9 = vpop.eup %2275 }
 0x147   : > { %v2278_v10 = vpop.eup %2277 }
 0x148   : > { %v659_v11 = vpack.c.bf16 %v2278_v10, %v2276_v9  ;;  %v2280_v13 = vpop.eup %2279 }
 0x149   : > { %v602_v32 = vadd.f32 1.0, %v2280_v13 }
 0x14a   : > { %2025 = vmatmul.mubr.bf16.gmra.mrb[48].mxu1 %v659_v11 }
 0x14b   : > { %2028 = vmatprep.mubr.msk.bf16.mxu1 %vm2442_vm0, %v2441_v1  ;;  %2281 = vrcp.f32 %v602_v32 }
 0x152   : > { %2029 = vmatmul.mubr.bf16.gmra.mrb[52].mxu1 %v660_v44 }
 0x153   : > { %2032 = vmatprep.mubr.msk.bf16.mxu1 %vm2442_vm0, %v2441_v1 }
 0x155   : > { %v2282_v41 = vpop.eup %2281 }
 0x156   : > { %v665_v44 = vpack.c.bf16 %v2282_v41, %v2282_v41 }
 0x15a   : > { %2033 = vmatmul.mubr.bf16.gmra.mrb[56].mxu1 %v661_v7  ;;  %v2182_v7 = vld [vmem:[%s2734_s3 + $0x38] sm:$0xff]  }
 0x15b   : > { %2036 = vmatprep.mubr.msk.bf16.mxu1 %vm2442_vm0, %v2441_v1  ;;  %2067 = vmatpush3.bf16.msra.mxu0 %v2182_v7 }
 0x162   : > { %2037 = vmatmul.mubr.bf16.gmra.mrb[60].mxu1 %v662_v37 }
 0x163   : > { %2040 = vmatprep.mubr.msk.bf16.mxu1 %vm2442_vm0, %v2441_v1 }
 0x16a   : > { %2041 = vmatmul.mubr.bf16.gmra.mrb[64].mxu1 %v663_v55 }
 0x16b   : > { %2044 = vmatprep.mubr.msk.bf16.mxu1 %vm2442_vm0, %v2441_v1 }
 0x172   : > { %2045 = vmatmul.mubr.bf16.gmra.mrb[68].mxu1 %v664_v3 }
 0x173   : > { %2048 = vmatprep.mubr.msk.bf16.mxu1 %vm2442_vm0, %v2441_v1 }
 0x17a   : > { %2049 = vmatmul.mubr.bf16.gmra.mrb[72].mxu1 %v665_v44 }
 0x1ec   : > { %v764_v14 = vpop.f32.mrb[24].mxu1 }
 0x1ed   : > { %v1647_v15 = vadd.f32 -1.0, %v764_v14  ;;  %v2002_v16 = vpop.f32.mrb[25].mxu1 }
 0x1ee   : > { %v767_v17 = vpop.f32.mrb[26].mxu1 }
 0x1ef   : > { %v891_v18 = vmax.f32 %v1647_v15, 0.0  ;;  %v1648_v19 = vadd.f32 -1.0, %v767_v17  ;;  %v2003_v20 = vpop.f32.mrb[27].mxu1 }
 0x1f1   : > { %v1672_v21 = vadd.f32 -13.0, %v891_v18  ;;  %v892_v22 = vmax.f32 %v1648_v19, 0.0 }
 0x1f3   : > { %v941_v23 = vmax.f32 %v1672_v21, 0.0  ;;  %v1673_v24 = vadd.f32 -13.0, %v892_v22 }
 0x1f5   : > { %v772_v25 = vpop.f32.mrb[28].mxu1  ;;  %2283 = vtanh.f32 %v941_v23  ;;  %v942_v26 = vmax.f32 %v1673_v24, 0.0 }
 0x1f6   : > { %v1649_v27 = vadd.f32 -1.0, %v772_v25  ;;  %v2006_v28 = vpop.f32.mrb[29].mxu1 }
 0x1f7   : > { %v775_v29 = vpop.f32.mrb[30].mxu1  ;;  %2285 = vtanh.f32 %v942_v26 }
 0x1f8   : > { %v893_v30 = vmax.f32 %v1649_v27, 0.0  ;;  %v1650_v31 = vadd.f32 -1.0, %v775_v29  ;;  %v2007_v33 = vpop.f32.mrb[31].mxu1 }
 0x1fa   : > { %v1674_v34 = vadd.f32 -13.0, %v893_v30  ;;  %v894_v35 = vmax.f32 %v1650_v31, 0.0 }
 0x1fc   : > { %v943_v36 = vmax.f32 %v1674_v34, 0.0  ;;  %v1675_v37 = vadd.f32 -13.0, %v894_v35 }
 0x1fd   : > { %v780_v38 = vpop.f32.mrb[32].mxu1 }
 0x1fe   : > { %2287 = vtanh.f32 %v943_v36  ;;  %v944_v39 = vmax.f32 %v1675_v37, 0.0  ;;  %v1651_v40 = vadd.f32 -1.0, %v780_v38  ;;  %v2010_v42 = vpop.f32.mrb[33].mxu1 }
 0x1ff   : > { %v783_v43 = vpop.f32.mrb[34].mxu1  ;;  %v2284_v45 = vpop.eup %2283 }
 0x200   : > { %2289 = vtanh.f32 %v944_v39  ;;  %v895_v46 = vmax.f32 %v1651_v40, 0.0  ;;  %v1652_v47 = vadd.f32 -1.0, %v783_v43  ;;  %v2011_v48 = vpop.f32.mrb[35].mxu1  ;;  %v991_v52 = vadd.f32 1.0, %v2284_v45 }
 0x201   : > { %v2286_v49 = vpop.eup %2285 }
 0x202   : > { %v1676_v50 = vadd.f32 -13.0, %v895_v46  ;;  %v896_v51 = vmax.f32 %v1652_v47, 0.0  ;;  %v992_v53 = vadd.f32 1.0, %v2286_v49 }
 0x204   : > { %v945_v54 = vmax.f32 %v1676_v50, 0.0  ;;  %v1677_v55 = vadd.f32 -13.0, %v896_v51  ;;  %v1016_v56 = vpack.c.bf16 %v992_v53, %v991_v52 }
 0x205   : > { %v788_v58 = vpop.f32.mrb[36].mxu1 }
 0x206   : > { %2291 = vtanh.f32 %v945_v54  ;;  %v946_v59 = vmax.f32 %v1677_v55, 0.0  ;;  %v1653_v60 = vadd.f32 -1.0, %v788_v58  ;;  %v2014_v61 = vpop.f32.mrb[37].mxu1  ;;  %2069 = vmatmul.mubr.bf16.vlgmr.msra.gmra.mrb[28].mxu0 %v1016_v56 }
 0x207   : > { %v791_v62 = vpop.f32.mrb[38].mxu1  ;;  %2072 = vmatprep.mubr.msk.bf16.mxu0 %vm2442_vm0, %v2441_v1 }
 0x208   : > { %v2288_v63 = vpop.eup %2287  ;;  %2293 = vtanh.f32 %v946_v59  ;;  %v897_v0 = vmax.f32 %v1653_v60, 0.0  ;;  %v1654_v2 = vadd.f32 -1.0, %v791_v62  ;;  %v2015_v3 = vpop.f32.mrb[39].mxu1 }
 0x209   : > { %v993_v9 = vadd.f32 1.0, %v2288_v63 }
 0x20a   : > { %v2290_v5 = vpop.eup %2289  ;;  %v1678_v6 = vadd.f32 -13.0, %v897_v0  ;;  %v898_v8 = vmax.f32 %v1654_v2, 0.0 }
 0x20b   : > { %v994_v10 = vadd.f32 1.0, %v2290_v5 }
 0x20c   : > { %v947_v11 = vmax.f32 %v1678_v6, 0.0  ;;  %v1679_v12 = vadd.f32 -13.0, %v898_v8 }
 0x20d   : > { %v796_v13 = vpop.f32.mrb[40].mxu1  ;;  %v1017_v32 = vpack.c.bf16 %v994_v10, %v993_v9 }
 0x20e   : > { %2295 = vtanh.f32 %v947_v11  ;;  %v948_v41 = vmax.f32 %v1679_v12, 0.0  ;;  %v1655_v44 = vadd.f32 -1.0, %v796_v13  ;;  %v2018_v57 = vpop.f32.mrb[41].mxu1 }
 0x20f   : > { %v799_v4 = vpop.f32.mrb[42].mxu1  ;;  %2073 = vmatmul.mubr.bf16.gmra.mrb[32].mxu0 %v1017_v32 }
 0x210   : > { %v2292_v7 = vpop.eup %2291  ;;  %2297 = vtanh.f32 %v948_v41  ;;  %v899_v14 = vmax.f32 %v1655_v44, 0.0  ;;  %v1656_v15 = vadd.f32 -1.0, %v799_v4  ;;  %v2019_v16 = vpop.f32.mrb[43].mxu1  ;;  %2076 = vmatprep.mubr.msk.bf16.mxu0 %vm2442_vm0, %v2441_v1 }
 0x211   : > { %v995_v20 = vadd.f32 1.0, %v2292_v7 }
 0x212   : > { %v2294_v17 = vpop.eup %2293  ;;  %v1680_v18 = vadd.f32 -13.0, %v899_v14  ;;  %v900_v19 = vmax.f32 %v1656_v15, 0.0 }
 0x213   : > { %v996_v21 = vadd.f32 1.0, %v2294_v17 }
 0x214   : > { %v949_v22 = vmax.f32 %v1680_v18, 0.0  ;;  %v1681_v23 = vadd.f32 -13.0, %v900_v19 }
 0x215   : > { %v804_v24 = vpop.f32.mrb[44].mxu1  ;;  %v1018_v25 = vpack.c.bf16 %v996_v21, %v995_v20 }
 0x216   : > { %2299 = vtanh.f32 %v949_v22  ;;  %v950_v26 = vmax.f32 %v1681_v23, 0.0  ;;  %v1657_v27 = vadd.f32 -1.0, %v804_v24  ;;  %v2022_v28 = vpop.f32.mrb[45].mxu1 }
 0x217   : > { %v807_v29 = vpop.f32.mrb[46].mxu1  ;;  %2077 = vmatmul.mubr.bf16.gmra.mrb[36].mxu0 %v1018_v25 }
 0x218   : > { %v2296_v30 = vpop.eup %2295  ;;  %2301 = vtanh.f32 %v950_v26  ;;  %v901_v31 = vmax.f32 %v1657_v27, 0.0  ;;  %v1658_v33 = vadd.f32 -1.0, %v807_v29  ;;  %v2023_v34 = vpop.f32.mrb[47].mxu1  ;;  %2080 = vmatprep.mubr.msk.bf16.mxu0 %vm2442_vm0, %v2441_v1 }
 0x219   : > { %v997_v38 = vadd.f32 1.0, %v2296_v30 }
 0x21a   : > { %v2298_v35 = vpop.eup %2297  ;;  %v1682_v36 = vadd.f32 -13.0, %v901_v31  ;;  %v902_v37 = vmax.f32 %v1658_v33, 0.0 }
 0x21b   : > { %v998_v39 = vadd.f32 1.0, %v2298_v35 }
 0x21c   : > { %v951_v40 = vmax.f32 %v1682_v36, 0.0  ;;  %v1683_v42 = vadd.f32 -13.0, %v902_v37 }
 0x21d   : > { %v812_v43 = vpop.f32.mrb[48].mxu1  ;;  %v1019_v45 = vpack.c.bf16 %v998_v39, %v997_v38 }
 0x21e   : > { %2303 = vtanh.f32 %v951_v40  ;;  %v952_v46 = vmax.f32 %v1683_v42, 0.0  ;;  %v1659_v47 = vadd.f32 -1.0, %v812_v43  ;;  %v2026_v48 = vpop.f32.mrb[49].mxu1 }
 0x21f   : > { %v815_v49 = vpop.f32.mrb[50].mxu1  ;;  %2081 = vmatmul.mubr.bf16.gmra.mrb[40].mxu0 %v1019_v45 }
 0x220   : > { %v2300_v50 = vpop.eup %2299  ;;  %2305 = vtanh.f32 %v952_v46  ;;  %v903_v51 = vmax.f32 %v1659_v47, 0.0  ;;  %v1660_v52 = vadd.f32 -1.0, %v815_v49  ;;  %v2027_v53 = vpop.f32.mrb[51].mxu1  ;;  %2084 = vmatprep.mubr.msk.bf16.mxu0 %vm2442_vm0, %v2441_v1 }
 0x221   : > { %v999_v58 = vadd.f32 1.0, %v2300_v50 }
 0x222   : > { %v2302_v54 = vpop.eup %2301  ;;  %v1684_v55 = vadd.f32 -13.0, %v903_v51  ;;  %v904_v56 = vmax.f32 %v1660_v52, 0.0 }
 0x223   : > { %v1000_v59 = vadd.f32 1.0, %v2302_v54 }
 0x224   : > { %v953_v60 = vmax.f32 %v1684_v55, 0.0  ;;  %v1685_v61 = vadd.f32 -13.0, %v904_v56 }
 0x225   : > { %v820_v62 = vpop.f32.mrb[52].mxu1  ;;  %v1020_v63 = vpack.c.bf16 %v1000_v59, %v999_v58 }
 0x226   : > { %2307 = vtanh.f32 %v953_v60  ;;  %v954_v0 = vmax.f32 %v1685_v61, 0.0  ;;  %v1661_v2 = vadd.f32 -1.0, %v820_v62  ;;  %v2030_v3 = vpop.f32.mrb[53].mxu1 }
 0x227   : > { %v823_v5 = vpop.f32.mrb[54].mxu1  ;;  %2085 = vmatmul.mubr.bf16.gmra.mrb[44].mxu0 %v1020_v63 }
 0x228   : > { %v2304_v6 = vpop.eup %2303  ;;  %2309 = vtanh.f32 %v954_v0  ;;  %v905_v8 = vmax.f32 %v1661_v2, 0.0  ;;  %v1662_v9 = vadd.f32 -1.0, %v823_v5  ;;  %v2031_v10 = vpop.f32.mrb[55].mxu1  ;;  %2088 = vmatprep.mubr.msk.bf16.mxu0 %vm2442_vm0, %v2441_v1 }
 0x229   : > { %v1001_v32 = vadd.f32 1.0, %v2304_v6 }
 0x22a   : > { %v2306_v11 = vpop.eup %2305  ;;  %v1686_v12 = vadd.f32 -13.0, %v905_v8  ;;  %v906_v13 = vmax.f32 %v1662_v9, 0.0 }
 0x22b   : > { %v1002_v41 = vadd.f32 1.0, %v2306_v11 }
 0x22c   : > { %v955_v44 = vmax.f32 %v1686_v12, 0.0  ;;  %v1687_v57 = vadd.f32 -13.0, %v906_v13 }
 0x22d   : > { %v828_v4 = vpop.f32.mrb[56].mxu1  ;;  %v1021_v7 = vpack.c.bf16 %v1002_v41, %v1001_v32 }
 0x22e   : > { %2311 = vtanh.f32 %v955_v44  ;;  %v956_v14 = vmax.f32 %v1687_v57, 0.0  ;;  %v1663_v15 = vadd.f32 -1.0, %v828_v4  ;;  %v2034_v16 = vpop.f32.mrb[57].mxu1 }
 0x22f   : > { %v831_v17 = vpop.f32.mrb[58].mxu1  ;;  %2089 = vmatmul.mubr.bf16.gmra.mrb[48].mxu0 %v1021_v7 }
 0x230   : > { %v2308_v18 = vpop.eup %2307  ;;  %2313 = vtanh.f32 %v956_v14  ;;  %v907_v19 = vmax.f32 %v1663_v15, 0.0  ;;  %v1664_v20 = vadd.f32 -1.0, %v831_v17  ;;  %v2035_v21 = vpop.f32.mrb[59].mxu1  ;;  %2092 = vmatprep.mubr.msk.bf16.mxu0 %vm2442_vm0, %v2441_v1 }
 0x231   : > { %v1003_v25 = vadd.f32 1.0, %v2308_v18 }
 0x232   : > { %v2310_v22 = vpop.eup %2309  ;;  %v1688_v23 = vadd.f32 -13.0, %v907_v19  ;;  %v908_v24 = vmax.f32 %v1664_v20, 0.0 }
 0x233   : > { %v1004_v26 = vadd.f32 1.0, %v2310_v22 }
 0x234   : > { %v957_v27 = vmax.f32 %v1688_v23, 0.0  ;;  %v1689_v28 = vadd.f32 -13.0, %v908_v24 }
 0x235   : > { %v836_v29 = vpop.f32.mrb[60].mxu1  ;;  %v1022_v30 = vpack.c.bf16 %v1004_v26, %v1003_v25 }
 0x236   : > { %2315 = vtanh.f32 %v957_v27  ;;  %v958_v31 = vmax.f32 %v1689_v28, 0.0  ;;  %v1665_v33 = vadd.f32 -1.0, %v836_v29  ;;  %v2038_v34 = vpop.f32.mrb[61].mxu1 }
 0x237   : > { %v839_v35 = vpop.f32.mrb[62].mxu1  ;;  %2093 = vmatmul.mubr.bf16.gmra.mrb[52].mxu0 %v1022_v30 }
 0x238   : > { %v2312_v36 = vpop.eup %2311  ;;  %2317 = vtanh.f32 %v958_v31  ;;  %v909_v37 = vmax.f32 %v1665_v33, 0.0  ;;  %v1666_v38 = vadd.f32 -1.0, %v839_v35  ;;  %v2039_v39 = vpop.f32.mrb[63].mxu1  ;;  %2096 = vmatprep.mubr.msk.bf16.mxu0 %vm2442_vm0, %v2441_v1 }
 0x239   : > { %v1005_v45 = vadd.f32 1.0, %v2312_v36 }
 0x23a   : > { %v2314_v40 = vpop.eup %2313  ;;  %v1690_v42 = vadd.f32 -13.0, %v909_v37  ;;  %v910_v43 = vmax.f32 %v1666_v38, 0.0 }
 0x23b   : > { %v1006_v46 = vadd.f32 1.0, %v2314_v40 }
 0x23c   : > { %v959_v47 = vmax.f32 %v1690_v42, 0.0  ;;  %v1691_v48 = vadd.f32 -13.0, %v910_v43 }
 0x23d   : > { %v844_v49 = vpop.f32.mrb[64].mxu1  ;;  %v1023_v50 = vpack.c.bf16 %v1006_v46, %v1005_v45 }
 0x23e   : > { %2319 = vtanh.f32 %v959_v47  ;;  %v960_v51 = vmax.f32 %v1691_v48, 0.0  ;;  %v1667_v52 = vadd.f32 -1.0, %v844_v49  ;;  %v2042_v53 = vpop.f32.mrb[65].mxu1 }
 0x23f   : > { %v847_v54 = vpop.f32.mrb[66].mxu1  ;;  %2097 = vmatmul.mubr.bf16.gmra.mrb[56].mxu0 %v1023_v50 }
 0x240   : > { %v2316_v55 = vpop.eup %2315  ;;  %2321 = vtanh.f32 %v960_v51  ;;  %v911_v56 = vmax.f32 %v1667_v52, 0.0  ;;  %v1668_v58 = vadd.f32 -1.0, %v847_v54  ;;  %v2043_v59 = vpop.f32.mrb[67].mxu1  ;;  %2100 = vmatprep.mubr.msk.bf16.mxu0 %vm2442_vm0, %v2441_v1 }
 0x241   : > { %v1007_v63 = vadd.f32 1.0, %v2316_v55 }
 0x242   : > { %v2318_v60 = vpop.eup %2317  ;;  %v1692_v61 = vadd.f32 -13.0, %v911_v56  ;;  %v912_v62 = vmax.f32 %v1668_v58, 0.0 }
 0x243   : > { %v1008_v0 = vadd.f32 1.0, %v2318_v60 }
 0x244   : > { %v961_v2 = vmax.f32 %v1692_v61, 0.0  ;;  %v1693_v3 = vadd.f32 -13.0, %v912_v62 }
 0x245   : > { %v852_v5 = vpop.f32.mrb[68].mxu1  ;;  %v1024_v6 = vpack.c.bf16 %v1008_v0, %v1007_v63 }
 0x246   : > { %2323 = vtanh.f32 %v961_v2  ;;  %v962_v8 = vmax.f32 %v1693_v3, 0.0  ;;  %v1669_v9 = vadd.f32 -1.0, %v852_v5  ;;  %v2046_v10 = vpop.f32.mrb[69].mxu1 }
 0x247   : > { %v855_v11 = vpop.f32.mrb[70].mxu1  ;;  %2101 = vmatmul.mubr.bf16.gmra.mrb[60].mxu0 %v1024_v6 }
 0x248   : > { %v2320_v12 = vpop.eup %2319  ;;  %2325 = vtanh.f32 %v962_v8  ;;  %v913_v13 = vmax.f32 %v1669_v9, 0.0  ;;  %v1670_v32 = vadd.f32 -1.0, %v855_v11  ;;  %v2047_v41 = vpop.f32.mrb[71].mxu1  ;;  %2104 = vmatprep.mubr.msk.bf16.mxu0 %vm2442_vm0, %v2441_v1 }
 0x249   : > { %v1009_v7 = vadd.f32 1.0, %v2320_v12 }
 0x24a   : > { %v2322_v44 = vpop.eup %2321  ;;  %v1694_v57 = vadd.f32 -13.0, %v913_v13  ;;  %v914_v4 = vmax.f32 %v1670_v32, 0.0 }
 0x24b   : > { %v1010_v14 = vadd.f32 1.0, %v2322_v44 }
 0x24c   : > { %v963_v15 = vmax.f32 %v1694_v57, 0.0  ;;  %v1695_v16 = vadd.f32 -13.0, %v914_v4 }
 0x24d   : > { %v860_v17 = vpop.f32.mrb[72].mxu1  ;;  %v1025_v18 = vpack.c.bf16 %v1010_v14, %v1009_v7 }
 0x24e   : > { %2327 = vtanh.f32 %v963_v15  ;;  %v964_v19 = vmax.f32 %v1695_v16, 0.0  ;;  %v1671_v20 = vadd.f32 -1.0, %v860_v17  ;;  %v2050_v21 = vpop.f32.mrb[73].mxu1 }
 0x24f   : > { %v863_v22 = vpop.f32.mrb[74].mxu1  ;;  %2105 = vmatmul.mubr.bf16.gmra.mrb[64].mxu0 %v1025_v18 }
 0x250   : > { %v2324_v23 = vpop.eup %2323  ;;  %2329 = vtanh.f32 %v964_v19  ;;  %v915_v24 = vmax.f32 %v1671_v20, 0.0  ;;  %v2051_v25 = vpop.f32.mrb[75].mxu1  ;;  %2108 = vmatprep.mubr.msk.bf16.mxu0 %vm2442_vm0, %v2441_v1 }
 0x251   : > { %v1011_v28 = vadd.f32 1.0, %v2324_v23 }
 0x252   : > { %v2326_v26 = vpop.eup %2325  ;;  %v1696_v27 = vadd.f32 -13.0, %v915_v24 }
 0x253   : > { %v1012_v29 = vadd.f32 1.0, %v2326_v26 }
 0x254   : > { %v965_v30 = vmax.f32 %v1696_v27, 0.0 }
 0x255   : > { %v1026_v31 = vpack.c.bf16 %v1012_v29, %v1011_v28 }
 0x256   : > { %2331 = vtanh.f32 %v965_v30 }
 0x257   : > { %2109 = vmatmul.mubr.bf16.gmra.mrb[68].mxu0 %v1026_v31 }
 0x258   : > { %v2328_v33 = vpop.eup %2327  ;;  %2112 = vmatprep.mubr.msk.bf16.mxu0 %vm2442_vm0, %v2441_v1 }
 0x259   : > { %v1013_v35 = vadd.f32 1.0, %v2328_v33 }
 0x25a   : > { %v2330_v34 = vpop.eup %2329 }
 0x25b   : > { %v1014_v36 = vadd.f32 1.0, %v2330_v34 }
 0x25d   : > { %v1027_v37 = vpack.c.bf16 %v1014_v36, %v1013_v35 }
 0x25f   : > { %2113 = vmatmul.mubr.bf16.gmra.mrb[72].mxu0 %v1027_v37 }
 0x260   : > { %v2332_v38 = vpop.eup %2331  ;;  %2116 = vmatprep.mubr.msk.bf16.mxu0 %vm2442_vm0, %v2441_v1 }
 0x261   : > { %v1015_v39 = vadd.f32 1.0, %v2332_v38 }
 0x263   : > { %v1028_v40 = vpack.c.bf16 %v1015_v39, %v1015_v39 }
 0x267   : > { %2117 = vmatmul.mubr.bf16.gmra.mrb[76].mxu0 %v1028_v40 }
 0x2d9   : > { %v1127_v42 = vpop.f32.mrb[28].mxu0 }
 0x2da   : > { %v1229_v43 = vmax.f32 %v1127_v42, 0.0  ;;  %v2070_v45 = vpop.f32.mrb[29].mxu0 }
 0x2db   : > { %v1130_v46 = vpop.f32.mrb[30].mxu0 }
 0x2dc   : > { %v1705_v47 = vmul.f32 -1.442695, %v1229_v43  ;;  %v1230_v48 = vmax.f32 %v1130_v46, 0.0  ;;  %v2071_v49 = vpop.f32.mrb[31].mxu0 }
 0x2de   : > { %2333 = vpow2.f32 %v1705_v47  ;;  %v1706_v50 = vmul.f32 -1.442695, %v1230_v48 }
 0x2e0   : > { %2335 = vpow2.f32 %v1706_v50 }
 0x2e2   : > { %v1135_v51 = vpop.f32.mrb[32].mxu0 }
 0x2e3   : > { %v1231_v52 = vmax.f32 %v1135_v51, 0.0  ;;  %v2074_v53 = vpop.f32.mrb[33].mxu0 }
 0x2e4   : > { %v1138_v54 = vpop.f32.mrb[34].mxu0 }
 0x2e5   : > { %v1707_v55 = vmul.f32 -1.442695, %v1231_v52  ;;  %v1232_v56 = vmax.f32 %v1138_v54, 0.0  ;;  %v2075_v1 = vpop.f32.mrb[35].mxu0 }
 0x2e7   : > { %2337 = vpow2.f32 %v1707_v55  ;;  %v1708_v58 = vmul.f32 -1.442695, %v1232_v56 }
 0x2e8   : > { %v2334_v59 = vpop.eup %2333 }
 0x2e9   : > { %2339 = vpow2.f32 %v1708_v58  ;;  %v1329_v60 = vadd.f32 1.0, %v2334_v59 }
 0x2ea   : > { %v1143_v61 = vpop.f32.mrb[36].mxu0  ;;  %v2336_v62 = vpop.eup %2335 }
 0x2eb   : > { %v1233_v63 = vmax.f32 %v1143_v61, 0.0  ;;  %v2078_v0 = vpop.f32.mrb[37].mxu0  ;;  %v1330_v2 = vadd.f32 1.0, %v2336_v62  ;;  %2341 = vrcp.f32 %v1329_v60 }
 0x2ec   : > { %v1146_v3 = vpop.f32.mrb[38].mxu0 }
 0x2ed   : > { %v1709_v5 = vmul.f32 -1.442695, %v1233_v63  ;;  %v1234_v6 = vmax.f32 %v1146_v3, 0.0  ;;  %v2079_v8 = vpop.f32.mrb[39].mxu0  ;;  %2343 = vrcp.f32 %v1330_v2 }
 0x2ef   : > { %2345 = vpow2.f32 %v1709_v5  ;;  %v1710_v9 = vmul.f32 -1.442695, %v1234_v6 }
 0x2f1   : > { %v2338_v10 = vpop.eup %2337  ;;  %2347 = vpow2.f32 %v1710_v9 }
 0x2f2   : > { %v1331_v11 = vadd.f32 1.0, %v2338_v10  ;;  %v1151_v12 = vpop.f32.mrb[40].mxu0 }
 0x2f3   : > { %v2340_v13 = vpop.eup %2339  ;;  %v1235_v32 = vmax.f32 %v1151_v12, 0.0  ;;  %v2082_v41 = vpop.f32.mrb[41].mxu0 }
 0x2f4   : > { %v1332_v44 = vadd.f32 1.0, %v2340_v13  ;;  %v1154_v57 = vpop.f32.mrb[42].mxu0  ;;  %2349 = vrcp.f32 %v1331_v11 }
 0x2f5   : > { %v1711_v4 = vmul.f32 -1.442695, %v1235_v32  ;;  %v1236_v7 = vmax.f32 %v1154_v57, 0.0  ;;  %v2083_v14 = vpop.f32.mrb[43].mxu0  ;;  %v2342_v15 = vpop.eup %2341 }
 0x2f6   : > { %2351 = vrcp.f32 %v1332_v44 }
 0x2f7   : > { %2353 = vpow2.f32 %v1711_v4  ;;  %v1712_v16 = vmul.f32 -1.442695, %v1236_v7  ;;  %v2344_v17 = vpop.eup %2343 }
 0x2f8   : > { %v1785_v19 = vpack.c.bf16 %v2344_v17, %v2342_v15 }
 0x2f9   : > { %v2346_v18 = vpop.eup %2345  ;;  %2355 = vpow2.f32 %v1712_v16 }
 0x2fa   : > { %v1333_v20 = vadd.f32 1.0, %v2346_v18  ;;  %v1159_v21 = vpop.f32.mrb[44].mxu0  ;;  %1786 = vst [vmem:[%s2713_s26] sm:$0xff] %v1785_v19  }
 0x2fb   : > { %v2348_v22 = vpop.eup %2347  ;;  %v1237_v23 = vmax.f32 %v1159_v21, 0.0  ;;  %v2086_v24 = vpop.f32.mrb[45].mxu0 }
 0x2fc   : > { %v1334_v25 = vadd.f32 1.0, %v2348_v22  ;;  %v1162_v26 = vpop.f32.mrb[46].mxu0  ;;  %2357 = vrcp.f32 %v1333_v20 }
 0x2fd   : > { %v1713_v27 = vmul.f32 -1.442695, %v1237_v23  ;;  %v1238_v28 = vmax.f32 %v1162_v26, 0.0  ;;  %v2087_v29 = vpop.f32.mrb[47].mxu0 }
 0x2fe   : > { %2359 = vrcp.f32 %v1334_v25  ;;  %v2350_v30 = vpop.eup %2349 }
 0x2ff   : > { %2361 = vpow2.f32 %v1713_v27  ;;  %v1714_v31 = vmul.f32 -1.442695, %v1238_v28 }
 0x300   : > { %v2352_v33 = vpop.eup %2351 }
 0x301   : > { %v2354_v34 = vpop.eup %2353  ;;  %v1790_v35 = vpack.c.bf16 %v2352_v33, %v2350_v30  ;;  %2363 = vpow2.f32 %v1714_v31 }
 0x302   : > { %v1335_v36 = vadd.f32 1.0, %v2354_v34  ;;  %v1167_v37 = vpop.f32.mrb[48].mxu0 }
 0x303   : > { %v2356_v38 = vpop.eup %2355  ;;  %1842 = vst [vmem:[%s2713_s26 + $0x8] sm:$0xff] %v1790_v35   ;;  %v1239_v39 = vmax.f32 %v1167_v37, 0.0  ;;  %v2090_v40 = vpop.f32.mrb[49].mxu0 }
 0x304   : > { %v1336_v42 = vadd.f32 1.0, %v2356_v38  ;;  %v1170_v43 = vpop.f32.mrb[50].mxu0  ;;  %2365 = vrcp.f32 %v1335_v36 }
 0x305   : > { %v1715_v45 = vmul.f32 -1.442695, %v1239_v39  ;;  %v1240_v46 = vmax.f32 %v1170_v43, 0.0  ;;  %v2091_v47 = vpop.f32.mrb[51].mxu0 }
 0x306   : > { %2367 = vrcp.f32 %v1336_v42  ;;  %v2358_v48 = vpop.eup %2357 }
 0x307   : > { %2369 = vpow2.f32 %v1715_v45  ;;  %v1716_v49 = vmul.f32 -1.442695, %v1240_v46 }
 0x308   : > { %v2360_v50 = vpop.eup %2359 }
 0x309   : > { %v2362_v51 = vpop.eup %2361  ;;  %v1795_v52 = vpack.c.bf16 %v2360_v50, %v2358_v48  ;;  %2371 = vpow2.f32 %v1716_v49 }
 0x30a   : > { %v1337_v53 = vadd.f32 1.0, %v2362_v51  ;;  %v1175_v54 = vpop.f32.mrb[52].mxu0 }
 0x30b   : > { %v2364_v55 = vpop.eup %2363  ;;  %1843 = vst [vmem:[%s2713_s26 + $0x10] sm:$0xff] %v1795_v52   ;;  %v1241_v56 = vmax.f32 %v1175_v54, 0.0  ;;  %v2094_v1 = vpop.f32.mrb[53].mxu0 }
 0x30c   : > { %v1338_v58 = vadd.f32 1.0, %v2364_v55  ;;  %v1178_v59 = vpop.f32.mrb[54].mxu0  ;;  %2373 = vrcp.f32 %v1337_v53 }
 0x30d   : > { %v1717_v60 = vmul.f32 -1.442695, %v1241_v56  ;;  %v1242_v61 = vmax.f32 %v1178_v59, 0.0  ;;  %v2095_v62 = vpop.f32.mrb[55].mxu0 }
 0x30e   : > { %2375 = vrcp.f32 %v1338_v58  ;;  %v2366_v63 = vpop.eup %2365 }
 0x30f   : > { %2377 = vpow2.f32 %v1717_v60  ;;  %v1718_v0 = vmul.f32 -1.442695, %v1242_v61 }
 0x310   : > { %v2368_v2 = vpop.eup %2367 }
 0x311   : > { %v2370_v3 = vpop.eup %2369  ;;  %v1800_v5 = vpack.c.bf16 %v2368_v2, %v2366_v63  ;;  %2379 = vpow2.f32 %v1718_v0 }
 0x312   : > { %v1339_v6 = vadd.f32 1.0, %v2370_v3  ;;  %v1183_v8 = vpop.f32.mrb[56].mxu0 }
 0x313   : > { %v2372_v9 = vpop.eup %2371  ;;  %1844 = vst [vmem:[%s2713_s26 + $0x18] sm:$0xff] %v1800_v5   ;;  %v1243_v10 = vmax.f32 %v1183_v8, 0.0  ;;  %v2098_v11 = vpop.f32.mrb[57].mxu0 }
 0x314   : > { %v1340_v12 = vadd.f32 1.0, %v2372_v9  ;;  %v1186_v13 = vpop.f32.mrb[58].mxu0  ;;  %2381 = vrcp.f32 %v1339_v6 }
 0x315   : > { %v1719_v32 = vmul.f32 -1.442695, %v1243_v10  ;;  %v1244_v41 = vmax.f32 %v1186_v13, 0.0  ;;  %v2099_v44 = vpop.f32.mrb[59].mxu0 }
 0x316   : > { %2383 = vrcp.f32 %v1340_v12  ;;  %v2374_v57 = vpop.eup %2373 }
 0x317   : > { %2385 = vpow2.f32 %v1719_v32  ;;  %v1720_v4 = vmul.f32 -1.442695, %v1244_v41 }
 0x318   : > { %v2376_v7 = vpop.eup %2375 }
 0x319   : > { %v2378_v14 = vpop.eup %2377  ;;  %v1805_v15 = vpack.c.bf16 %v2376_v7, %v2374_v57  ;;  %2387 = vpow2.f32 %v1720_v4 }
 0x31a   : > { %v1341_v16 = vadd.f32 1.0, %v2378_v14  ;;  %v1191_v17 = vpop.f32.mrb[60].mxu0 }
 0x31b   : > { %v2380_v18 = vpop.eup %2379  ;;  %1845 = vst [vmem:[%s2713_s26 + $0x20] sm:$0xff] %v1805_v15   ;;  %v1245_v19 = vmax.f32 %v1191_v17, 0.0  ;;  %v2102_v20 = vpop.f32.mrb[61].mxu0 }
 0x31c   : > { %v1342_v21 = vadd.f32 1.0, %v2380_v18  ;;  %v1194_v22 = vpop.f32.mrb[62].mxu0  ;;  %2389 = vrcp.f32 %v1341_v16 }
 0x31d   : > { %v1721_v23 = vmul.f32 -1.442695, %v1245_v19  ;;  %v1246_v24 = vmax.f32 %v1194_v22, 0.0  ;;  %v2103_v25 = vpop.f32.mrb[63].mxu0 }
 0x31e   : > { %2391 = vrcp.f32 %v1342_v21  ;;  %v2382_v26 = vpop.eup %2381 }
 0x31f   : > { %2393 = vpow2.f32 %v1721_v23  ;;  %v1722_v27 = vmul.f32 -1.442695, %v1246_v24 }
 0x320   : > { %v2384_v28 = vpop.eup %2383 }
 0x321   : > { %v2386_v29 = vpop.eup %2385  ;;  %v1810_v30 = vpack.c.bf16 %v2384_v28, %v2382_v26  ;;  %2395 = vpow2.f32 %v1722_v27 }
 0x322   : > { %v1343_v31 = vadd.f32 1.0, %v2386_v29  ;;  %v1199_v33 = vpop.f32.mrb[64].mxu0 }
 0x323   : > { %v2388_v34 = vpop.eup %2387  ;;  %1846 = vst [vmem:[%s2713_s26 + $0x28] sm:$0xff] %v1810_v30   ;;  %v1247_v35 = vmax.f32 %v1199_v33, 0.0  ;;  %v2106_v36 = vpop.f32.mrb[65].mxu0 }
 0x324   : > { %v1344_v37 = vadd.f32 1.0, %v2388_v34  ;;  %v1202_v38 = vpop.f32.mrb[66].mxu0  ;;  %2397 = vrcp.f32 %v1343_v31 }
 0x325   : > { %v1723_v39 = vmul.f32 -1.442695, %v1247_v35  ;;  %v1248_v40 = vmax.f32 %v1202_v38, 0.0  ;;  %v2107_v42 = vpop.f32.mrb[67].mxu0 }
 0x326   : > { %2399 = vrcp.f32 %v1344_v37  ;;  %v2390_v43 = vpop.eup %2389 }
 0x327   : > { %2401 = vpow2.f32 %v1723_v39  ;;  %v1724_v45 = vmul.f32 -1.442695, %v1248_v40 }
 0x328   : > { %v2392_v46 = vpop.eup %2391 }
 0x329   : > { %v2394_v47 = vpop.eup %2393  ;;  %v1815_v48 = vpack.c.bf16 %v2392_v46, %v2390_v43  ;;  %2403 = vpow2.f32 %v1724_v45 }
 0x32a   : > { %v1345_v49 = vadd.f32 1.0, %v2394_v47  ;;  %v1207_v50 = vpop.f32.mrb[68].mxu0 }
 0x32b   : > { %v2396_v51 = vpop.eup %2395  ;;  %1847 = vst [vmem:[%s2713_s26 + $0x30] sm:$0xff] %v1815_v48   ;;  %v1249_v52 = vmax.f32 %v1207_v50, 0.0  ;;  %v2110_v53 = vpop.f32.mrb[69].mxu0 }
 0x32c   : > { %v1346_v54 = vadd.f32 1.0, %v2396_v51  ;;  %v1210_v55 = vpop.f32.mrb[70].mxu0  ;;  %2405 = vrcp.f32 %v1345_v49 }
 0x32d   : > { %v1725_v56 = vmul.f32 -1.442695, %v1249_v52  ;;  %v1250_v1 = vmax.f32 %v1210_v55, 0.0  ;;  %v2111_v58 = vpop.f32.mrb[71].mxu0 }
 0x32e   : > { %2407 = vrcp.f32 %v1346_v54  ;;  %v2398_v59 = vpop.eup %2397 }
 0x32f   : > { %2409 = vpow2.f32 %v1725_v56  ;;  %v1726_v60 = vmul.f32 -1.442695, %v1250_v1 }
 0x330   : > { %v2400_v61 = vpop.eup %2399 }
 0x331   : > { %v2402_v62 = vpop.eup %2401  ;;  %v1820_v63 = vpack.c.bf16 %v2400_v61, %v2398_v59  ;;  %2411 = vpow2.f32 %v1726_v60 }
 0x332   : > { %v1347_v0 = vadd.f32 1.0, %v2402_v62  ;;  %v1215_v2 = vpop.f32.mrb[72].mxu0 }
 0x333   : > { %v2404_v3 = vpop.eup %2403  ;;  %1848 = vst [vmem:[%s2713_s26 + $0x38] sm:$0xff] %v1820_v63   ;;  %v1251_v5 = vmax.f32 %v1215_v2, 0.0  ;;  %v2114_v6 = vpop.f32.mrb[73].mxu0 }
 0x334   : > { %v1348_v8 = vadd.f32 1.0, %v2404_v3  ;;  %v1218_v9 = vpop.f32.mrb[74].mxu0  ;;  %2413 = vrcp.f32 %v1347_v0 }
 0x335   : > { %v1727_v10 = vmul.f32 -1.442695, %v1251_v5  ;;  %v1252_v11 = vmax.f32 %v1218_v9, 0.0  ;;  %v2115_v12 = vpop.f32.mrb[75].mxu0 }
 0x336   : > { %2415 = vrcp.f32 %v1348_v8  ;;  %v2406_v13 = vpop.eup %2405 }
 0x337   : > { %2417 = vpow2.f32 %v1727_v10  ;;  %v1728_v32 = vmul.f32 -1.442695, %v1252_v11 }
 0x338   : > { %v2408_v41 = vpop.eup %2407 }
 0x339   : > { %v2410_v44 = vpop.eup %2409  ;;  %v1825_v57 = vpack.c.bf16 %v2408_v41, %v2406_v13  ;;  %2419 = vpow2.f32 %v1728_v32 }
 0x33a   : > { %v1349_v4 = vadd.f32 1.0, %v2410_v44  ;;  %v1223_v7 = vpop.f32.mrb[76].mxu0 }
 0x33b   : > { %v2412_v14 = vpop.eup %2411  ;;  %1849 = vst [vmem:[%s2713_s26 + $0x40] sm:$0xff] %v1825_v57   ;;  %v1253_v15 = vmax.f32 %v1223_v7, 0.0  ;;  %v2118_v16 = vpop.f32.mrb[77].mxu0 }
 0x33c   : > { %v1350_v17 = vadd.f32 1.0, %v2412_v14  ;;  %v1226_v18 = vpop.f32.mrb[78].mxu0  ;;  %2421 = vrcp.f32 %v1349_v4 }
 0x33d   : > { %v1729_v19 = vmul.f32 -1.442695, %v1253_v15  ;;  %v2119_v20 = vpop.f32.mrb[79].mxu0 }
 0x33e   : > { %2423 = vrcp.f32 %v1350_v17  ;;  %v2414_v21 = vpop.eup %2413 }
 0x33f   : > { %2425 = vpow2.f32 %v1729_v19 }
 0x340   : > { %v2416_v22 = vpop.eup %2415 }
 0x341   : > { %v2418_v23 = vpop.eup %2417  ;;  %v1830_v24 = vpack.c.bf16 %v2416_v22, %v2414_v21 }
 0x342   : > { %v1351_v25 = vadd.f32 1.0, %v2418_v23 }
 0x343   : > { %v2420_v26 = vpop.eup %2419  ;;  %1850 = vst [vmem:[%s2713_s26 + $0x48] sm:$0xff] %v1830_v24  }
 0x344   : > { %v1352_v27 = vadd.f32 1.0, %v2420_v26  ;;  %2427 = vrcp.f32 %v1351_v25 }
 0x346   : > { %2429 = vrcp.f32 %v1352_v27  ;;  %v2422_v28 = vpop.eup %2421 }
 0x348   : > { %v2424_v29 = vpop.eup %2423 }
 0x349   : > { %v2426_v30 = vpop.eup %2425  ;;  %v1835_v31 = vpack.c.bf16 %v2424_v29, %v2422_v28 }
 0x34a   : > { %v1353_v33 = vadd.f32 1.0, %v2426_v30 }
 0x34b   : > { %1851 = vst [vmem:[%s2713_s26 + $0x50] sm:$0xff] %v1835_v31  }
 0x34c   : > { %2431 = vrcp.f32 %v1353_v33 }
 0x34e   : > { %v2428_v34 = vpop.eup %2427 }
 0x350   : > { %v2430_v35 = vpop.eup %2429 }
 0x351   : > { %v1840_v36 = vpack.c.bf16 %v2430_v35, %v2428_v34 }
 0x353   : > { %1852 = vst [vmem:[%s2713_s26 + $0x58] sm:$0xff] %v1840_v36  }
 0x356   : > { %v2432_v37 = vpop.eup %2431 }
 0x357   : > { %v1781_v38 = vpack.c.bf16 %v2432_v37, %v2432_v37 }
 0x359   : > { %1529 = vst [vmem:[%s2713_s26 + $0x60] sm:$0xf] %v1781_v38 }
 0x35a PF: > { %s14_s15 = sadd.s32 1, %s2439_s15  }
 0x35b   : > { %p11_p4 = scmp.ge.s32.totalorder %s14_s15, 4  }
 0x35d   :  { %13 = sbr.rel (!%p11_p4) target bundleno = 1 (0x1), region = 66 }

</bundles_post_ra>
